<compile_context>
chip_gen: v6e
topology: v6e:2x2x1
jax: 0.10.0
libtpu: 0.0.40
codegen_flags: <defaults>
</compile_context>

<pallas_src>
import jax
import jax.numpy as jnp
from jax.experimental import pallas as pl
from jax.experimental.pallas import tpu as pltpu


def _affine_kernel(x_ref, w_ref, b_ref, o_ref):
    # w_ref/b_ref are either (tile_r, 1) [per-row params, path A] or
    # (1, tile_l) [per-lane params, path B]; both broadcast against x.
    x = x_ref[...].astype(jnp.float32)
    o_ref[...] = (x * w_ref[...] + b_ref[...]).astype(o_ref.dtype)


def _vmem_limit_bytes():
    """~75% of physical VMEM (48 MiB on v7x, 96 MiB on v5e/v6e)."""
    try:
        cap = pltpu.get_tpu_info().vmem_capacity_bytes
        return max(40 * 1024 * 1024, int(cap) * 3 // 4)
    except Exception:
        return 48 * 1024 * 1024  # safe on every generation


def _pick_lane_tile(cols, cap=4096):
    """Lane-axis tile: full extent if small, else a 128-aligned, balanced split."""
    if cols <= cap:
        return cols  # full extent is always a legal block dim
    n_blocks = pl.cdiv(cols, cap)
    return 128 * (-(-cols // (128 * n_blocks)))  # 128 * ceil(cols / (128 * n_blocks))


def _pick_row_tile(rows, tile_l, itemsize, budget_bytes):
    """Row-axis tile under a per-tile byte budget, rounded to the dtype-aware
    sublane packing multiple (8 for f32, 16 for bf16, 32 for int8/fp8)."""
    sub = max(8, 32 // itemsize)
    tr = budget_bytes // (tile_l * itemsize)
    if tr >= rows:
        return rows
    tr = max(sub, (tr // sub) * sub)
    return rows if tr >= rows else tr


def affine_channel(x_nchw, weight, bias, *, donate_input=False):
    """x_nchw: (N, C, H, W); weight, bias: (C,). Returns (N, C, H, W)."""
    N, C, H, W = x_nchw.shape
    HW = H * W
    dtype = x_nchw.dtype
    itemsize = jnp.dtype(dtype).itemsize

    # Params kept/computed in f32 (matches PyTorch f32 parameters exactly).
    w32 = weight.astype(jnp.float32)
    b32 = bias.astype(jnp.float32)

    vmem_limit = _vmem_limit_bytes()
    budget = min(8 * 1024 * 1024, vmem_limit // 5)  # 4x tile (dbl-buffered in+out) + slack

    if HW % 128 == 0:
        # --- Path A: lane-dense (N*C, H*W), per-row scale/shift ------------
        R, L = N * C, HW
        flat = x_nchw.reshape(R, L)                       # metadata-only
        # Row r is channel r % C.  (If params are static under jit this
        # tile/reshape constant-folds; it is two tiny XLA ops otherwise.)
        w_side = jnp.tile(w32, N).reshape(R, 1)
        b_side = jnp.tile(b32, N).reshape(R, 1)
        tile_l = _pick_lane_tile(L)
        tile_r = _pick_row_tile(R, tile_l, itemsize, budget)
        # Rows outer / lanes inner so the (tile_r, 1) param blocks keep the
        # same block index across consecutive steps (fetched once per row block).
        grid = (pl.cdiv(R, tile_r), pl.cdiv(L, tile_l))
        x_spec = pl.BlockSpec((tile_r, tile_l), lambda i, j: (i, j))
        w_spec = pl.BlockSpec((tile_r, 1), lambda i, j: (i, 0))
        b_spec = pl.BlockSpec((tile_r, 1), lambda i, j: (i, 0))
        out_spec = pl.BlockSpec((tile_r, tile_l), lambda i, j: (i, j))
    else:
        # --- Path B: H*W not 128-aligned -> (N, C*H*W), per-lane params ----
        R, L = N, C * HW
        flat = x_nchw.reshape(R, L)                       # metadata-only
        w_side = jnp.repeat(w32, HW).reshape(1, L)        # lane k -> weight[k // HW]
        b_side = jnp.repeat(b32, HW).reshape(1, L)
        tile_l = _pick_lane_tile(L)
        tile_r = _pick_row_tile(R, tile_l, itemsize, budget)
        # Lanes outer / rows inner so each (1, tile_l) param block is fetched
        # once and reused across all row blocks.
        grid = (pl.cdiv(L, tile_l), pl.cdiv(R, tile_r))
        x_spec = pl.BlockSpec((tile_r, tile_l), lambda j, i: (i, j))
        w_spec = pl.BlockSpec((1, tile_l), lambda j, i: (0, j))
        b_spec = pl.BlockSpec((1, tile_l), lambda j, i: (0, j))
        out_spec = pl.BlockSpec((tile_r, tile_l), lambda j, i: (i, j))

    cost = pl.CostEstimate(
        flops=2 * R * L,
        transcendentals=0,
        bytes_accessed=2 * R * L * itemsize + 2 * int(w_side.size) * 4,
    )

    extra = {}
    if donate_input:
        # In-place update (skips the extra output allocation) when the caller
        # donates x; off by default so the input stays valid for reuse.
        extra["input_output_aliases"] = {0: 0}

    # TODO(synk): verify on v7x (trace/bundle dump) that ("parallel","parallel")
    # shards the grid across both TensorCores; if not, switch the bulk axis to
    # pltpu.CORE_PARALLEL.
    out_flat = pl.pallas_call(
        _affine_kernel,
        out_shape=jax.ShapeDtypeStruct((R, L), dtype),
        grid_spec=pltpu.PrefetchScalarGridSpec(
            num_scalar_prefetch=0,
            grid=grid,
            in_specs=[x_spec, w_spec, b_spec],
            out_specs=out_spec,
        ),
        compiler_params=pltpu.CompilerParams(
            dimension_semantics=("parallel", "parallel"),
            vmem_limit_bytes=vmem_limit,
        ),
        cost_estimate=cost,
        **extra,
    )(flat, w_side, b_side)

    return out_flat.reshape(N, C, H, W)


if __name__ == "__main__":
    key = jax.random.PRNGKey(0)
    k_x, k_w, k_b = jax.random.split(key, 3)

    N, C, H, W = 2, 4, 16, 16
    x = jax.random.normal(k_x, (N, C, H, W), dtype=jnp.float32)
    weight = jax.random.normal(k_w, (C,), dtype=jnp.float32)  # torch.randn(num_features)
    bias = jax.random.normal(k_b, (C,), dtype=jnp.float32)    # torch.randn(num_features)

    # Path A: H*W = 256 (128-aligned).
    out = jax.block_until_ready(affine_channel(x, weight, bias))
    ref = x * weight.reshape(1, C, 1, 1) + bias.reshape(1, C, 1, 1)
    assert out.shape == (N, C, H, W)
    assert jnp.allclose(out, ref, atol=1e-6, rtol=1e-6)

    # Path B: H*W = 49 (not 128-aligned) exercises the lane-dense fallback layout.
    x2 = jax.random.normal(k_x, (N, C, 7, 7), dtype=jnp.float32)
    out2 = jax.block_until_ready(affine_channel(x2, weight, bias))
    ref2 = x2 * weight.reshape(1, C, 1, 1) + bias.reshape(1, C, 1, 1)
    assert out2.shape == (N, C, 7, 7)
    assert jnp.allclose(out2, ref2, atol=1e-6, rtol=1e-6)

    print("KERNEL_OK")
</pallas_src>

<mosaic_0001>
module attributes {stable_mosaic.version = 11 : i64} {
  func.func @_affine_kernel(%arg0: i32, %arg1: i32, %arg2: memref<8x256xf32, #tpu.memory_space<vmem>>, %arg3: memref<8x1xf32, #tpu.memory_space<vmem>>, %arg4: memref<8x1xf32, #tpu.memory_space<vmem>>, %arg5: memref<8x256xf32, #tpu.memory_space<vmem>>) attributes {dimension_semantics = [#tpu.dimension_semantics<parallel>, #tpu.dimension_semantics<parallel>], iteration_bounds = array<i64: 1, 1>, scalar_prefetch = 0 : i64, scratch_operands = 0 : i64, tpu.core_type = #tpu.core_type<tc>, window_params = [{transform_indices = @transform_0, window_bounds = array<i64: 8, 256>}, {transform_indices = @transform_1, window_bounds = array<i64: 8, 1>}, {transform_indices = @transform_2, window_bounds = array<i64: 8, 1>}, {transform_indices = @transform_3, window_bounds = array<i64: 8, 256>}]} {
    %c0 = arith.constant 0 : index
    %c0_0 = arith.constant 0 : index
    %0 = vector.load %arg2[%c0, %c0_0] : memref<8x256xf32, #tpu.memory_space<vmem>>, vector<8x256xf32>
    %c0_1 = arith.constant 0 : index
    %c0_2 = arith.constant 0 : index
    %1 = vector.load %arg3[%c0_1, %c0_2] : memref<8x1xf32, #tpu.memory_space<vmem>>, vector<8x1xf32>
    %2 = vector.broadcast %1 : vector<8x1xf32> to vector<8x256xf32>
    %3 = arith.mulf %0, %2 : vector<8x256xf32>
    %c0_3 = arith.constant 0 : index
    %c0_4 = arith.constant 0 : index
    %4 = vector.load %arg4[%c0_3, %c0_4] : memref<8x1xf32, #tpu.memory_space<vmem>>, vector<8x1xf32>
    %5 = vector.broadcast %4 : vector<8x1xf32> to vector<8x256xf32>
    %6 = arith.addf %3, %5 : vector<8x256xf32>
    %c0_5 = arith.constant 0 : index
    %c0_6 = arith.constant 0 : index
    %7 = vector.load %arg5[%c0_5, %c0_6] : memref<8x256xf32, #tpu.memory_space<vmem>>, vector<8x256xf32>
    tpu.vector_store %arg5[%c0_5, %c0_6], %6 {strides = array<i32>} : memref<8x256xf32, #tpu.memory_space<vmem>>, vector<8x256xf32>,
    return
  }
  func.func @transform_0(%arg0: i32, %arg1: i32) -> (i32, i32) {
    %c0_i32 = arith.constant 0 : i32
    return %arg0, %arg1 : i32, i32
  }
  func.func @transform_1(%arg0: i32, %arg1: i32) -> (i32, i32) {
    %c0_i32 = arith.constant 0 : i32
    %c0_i32_0 = arith.constant 0 : i32
    return %arg0, %c0_i32 : i32, i32
  }
  func.func @transform_2(%arg0: i32, %arg1: i32) -> (i32, i32) {
    %c0_i32 = arith.constant 0 : i32
    %c0_i32_0 = arith.constant 0 : i32
    return %arg0, %c0_i32 : i32, i32
  }
  func.func @transform_3(%arg0: i32, %arg1: i32) -> (i32, i32) {
    %c0_i32 = arith.constant 0 : i32
    return %arg0, %arg1 : i32, i32
  }
}

</mosaic_0001>

<bundles_post_ra>
// kernel: tpu_custom_call.1
= control target key start
LH: loop header
LB: loop body
LE: loop exit
PB: predicated region body
PF: predicated region fallthrough
CT: control target
= control target key end

     0   :  { %v74_v1 = vmov 0   ;;  %s111_s0 = inlined_call_operand.vmem [shape: f32[8,256], index: 0, kind: input, shape index: {}]   ;;  %s112_s1 = inlined_call_operand.vmem [shape: f32[8,1], index: 1, kind: input, shape index: {}]   ;;  %s113_s2 = inlined_call_operand.vmem [shape: f32[8,1], index: 2, kind: input, shape index: {}]   ;;  %s114_s3 = inlined_call_operand.hbm [shape: f32[8,256], index: 3, kind: output, shape index: {}]  }
   0x1   :  { %v17_v0 = vld [vmem:[%s112_s1] sm:$0xff]  ;;  %51 = vset.pattern.permute.xlu0 %v74_v1 }
   0x2   :  { %8 = vsyncpa [#allocation3], 0  ;;  %20 = vperm.xlu0 %51, %v17_v0   ;;  %v25_v2 = vld [vmem:[%s113_s2] sm:$0xff]  ;;  %v16_v5 = vld [vmem:[%s111_s0 + $0x8] sm:$0xff]  ;;  %s75_s20 = smov [#allocation2]  }
   0x3   :  { %v15_v4 = vld [vmem:[%s111_s0] sm:$0xff]  ;;  %s41_s1 = sshll.u32 %s75_s20, 4  ;;  %s42_s1 = int_to_ptr.vmem [resolvable:$true] %s41_s1 }
   0x4   :  { %s52_s2 = scalar_lea.vmem %s42_s1, 256  ;;  %p57_p1 = scmp.lt.s32.totalorder %s42_s1, %s42_s1 }
   0x5   :  { %p53_p0 = scmp.ne.s32.totalorder %s42_s1, %s52_s2  ;;  %p58_p2 = scmp.lt.s32.totalorder %s52_s2, %s52_s2 }
   0x6   :  { %28 = vperm.xlu0 %51, %v25_v2  }
   0x7   :  { %p59_p3 = por %p58_p2, %p57_p1 }
   0x9   :  { %p60_p4 = pnand %p59_p3, %p53_p0 }
  0x7d   :  { %v21_v3 = vpop.permute.xlu0 %20 }
  0x7e   :  { %v23_v6 = vmul.f32 %v21_v3, %v15_v4  ;;  %v24_v7 = vmul.f32 %v21_v3, %v16_v5 }
  0x81   :  { %v29_v8 = vpop.permute.xlu0 %28 }
  0x82   :  { %v31_v9 = vadd.f32 %v29_v8, %v23_v6  ;;  %v32_v10 = vadd.f32 %v29_v8, %v24_v7 }
  0x84   :  { %33 = vst [vmem:[#allocation2] sm:$0xff] %v31_v9  ;;  %34 = vst [vmem:[#allocation2 + $0x8] sm:$0xff] %v32_v10 }
  0x85   :  { %63 = shalt.err (!%p60_p4)
}
  0x86   :  { %44 = dma.vmem_to_hbm [thread:$0]  %s42_s1, 256, %s114_s3, [#allocation3]  }
  0x87   :  { %72 = dma.done.wait [#allocation3], 256  }
  0x88   :  { %73 = vsyncadd [#allocation3], 4294967040 }
  0x89   :  { %48 = vsyncpa [#allocation3], 1 }

</bundles_post_ra>
